<compile_context>
chip_gen: v7x
topology: tpu7x:2x2x1
jax: 0.10.0
libtpu: 0.0.40
codegen_flags: <defaults>
</compile_context>

<pallas_src>
import functools

import jax
import jax.numpy as jnp
from jax.experimental import pallas as pl
from jax.experimental.pallas import tpu as pltpu


def _round_up(a, b):
    return (a + b - 1) // b * b


# ----------------------------------------------------------------------------
# Pallas kernel: out = [relu]( patches @ W + bias  [+ res | + xs @ Wsc + bsc] )
# ----------------------------------------------------------------------------
def _fused_gemm_kernel(p_ref, w_ref, b_ref, *rest, relu, mode):
    if mode == "none":
        (o_ref,) = rest
    elif mode == "add":
        r_ref, o_ref = rest
    else:  # "project": fused 1x1-conv + BN projection shortcut
        xs_ref, wsc_ref, bsc_ref, o_ref = rest

    acc = jnp.dot(p_ref[...], w_ref[...], preferred_element_type=jnp.float32)
    acc = acc + b_ref[...]
    if mode == "add":
        acc = acc + r_ref[...].astype(jnp.float32)
    elif mode == "project":
        acc = acc + jnp.dot(xs_ref[...], wsc_ref[...],
                            preferred_element_type=jnp.float32) + bsc_ref[...]
    if relu:
        acc = jnp.maximum(acc, 0.0)
    o_ref[...] = acc.astype(o_ref.dtype)


def _pick_tm(m):
    """Row-tile size: large tiles for pipeline efficiency, but keep >=2 grid
    steps when possible so ("parallel",) can use both v7x TensorCores."""
    m8 = _round_up(m, 8)
    if m8 <= 256:
        return m8
    if m8 <= 1024:
        return 256
    return 512


def fused_conv_gemm(patches, w_mat, bias, *, relu, out_dtype=jnp.float32,
                    residual=None, shortcut=None):
    """patches: (M, K) bf16;  w_mat: (K, Cp) bf16 with BN scale folded in;
    bias: (Cp,) f32.  residual: (M, Cp) bf16 added before relu (identity
    shortcut).  shortcut: (xs (M, Cin) bf16, wsc (Cin, Cp) bf16, bsc (Cp,) f32)
    fused 1x1 projection added before relu.  Cp must be a multiple of 128."""
    m, k = patches.shape
    cout_p = w_mat.shape[1]
    tm = _pick_tm(m)
    mp = _round_up(m, tm)
    if mp != m:
        # TODO(synk): rare tail pad; for production shapes choose tm | M or pad
        # the small NHWC tensor upstream instead of the 9x patch matrix.
        patches = jnp.pad(patches, ((0, mp - m), (0, 0)))
        if residual is not None:
            residual = jnp.pad(residual, ((0, mp - m), (0, 0)))
        if shortcut is not None:
            xs, wsc, bsc = shortcut
            shortcut = (jnp.pad(xs, ((0, mp - m), (0, 0))), wsc, bsc)

    args = [patches, w_mat, bias.reshape(1, cout_p)]
    in_specs = [
        pl.BlockSpec((tm, k), lambda i: (i, 0)),
        # constant-index blocks: DMA'd once, stay resident across grid steps
        pl.BlockSpec((k, cout_p), lambda i: (0, 0)),
        pl.BlockSpec((1, cout_p), lambda i: (0, 0)),
    ]
    blk_bytes = (tm * k * 2 + k * cout_p * 2 + cout_p * 4
                 + tm * cout_p * jnp.dtype(out_dtype).itemsize)

    mode = "none"
    if residual is not None:
        mode = "add"
        args.append(residual)
        in_specs.append(pl.BlockSpec((tm, cout_p), lambda i: (i, 0)))
        blk_bytes += tm * cout_p * 2
    elif shortcut is not None:
        mode = "project"
        xs, wsc, bsc = shortcut
        cin = xs.shape[1]
        args += [xs, wsc, bsc.reshape(1, cout_p)]
        in_specs += [
            pl.BlockSpec((tm, cin), lambda i: (i, 0)),
            pl.BlockSpec((cin, cout_p), lambda i: (0, 0)),
            pl.BlockSpec((1, cout_p), lambda i: (0, 0)),
        ]
        blk_bytes += tm * cin * 2 + cin * cout_p * 2 + cout_p * 4

    # Explicit VMEM budget (x2 for double-buffered pipelining) for large layers;
    # keep below v7x's 64 MiB physical VMEM.
    cparams = dict(dimension_semantics=("parallel",))
    vmem_est = 2 * blk_bytes + (1 << 20)
    if vmem_est > 12 * (1 << 20):
        cparams["vmem_limit_bytes"] = int(min(vmem_est, 48 * (1 << 20)))

    kernel = functools.partial(_fused_gemm_kernel, relu=relu, mode=mode)
    out = pl.pallas_call(
        kernel,
        out_shape=jax.ShapeDtypeStruct((mp, cout_p), out_dtype),
        grid=(mp // tm,),
        in_specs=in_specs,
        out_specs=pl.BlockSpec((tm, cout_p), lambda i: (i, 0)),
        compiler_params=pltpu.CompilerParams(**cparams),
    )(*args)
    return out[:m]


# ----------------------------------------------------------------------------
# Plain-JAX glue: im2col, parameter setup, forward wiring
# ----------------------------------------------------------------------------
def _im2col3x3(x_nhwc, stride):
    """x: (N, H, W, C) -> (N*Ho*Wo, 9*C) patches for a 3x3 / pad=1 conv."""
    n, h, w, c = x_nhwc.shape
    ho = (h - 1) // stride + 1
    wo = (w - 1) // stride + 1
    xp = jnp.pad(x_nhwc, ((0, 0), (1, 1), (1, 1), (0, 0)))
    cols = []
    for dy in range(3):
        for dx in range(3):
            cols.append(xp[:, dy:dy + (ho - 1) * stride + 1:stride,
                           dx:dx + (wo - 1) * stride + 1:stride, :])
    return jnp.concatenate(cols, axis=-1).reshape(n * ho * wo, 9 * c)


def init_basic_block_params(key, *, in_c, out_c, stride, eps=1e-5):
    ks = jax.random.split(key, 6)

    def bn_init(k, c):
        k1, k2, k3, k4 = jax.random.split(k, 4)
        gamma = 1.0 + 0.1 * jax.random.normal(k1, (c,), jnp.float32)
        beta = 0.1 * jax.random.normal(k2, (c,), jnp.float32)
        mean = 0.1 * jax.random.normal(k3, (c,), jnp.float32)
        var = jax.random.uniform(k4, (c,), jnp.float32, minval=0.5, maxval=1.5)
        return gamma, beta, mean, var

    def fold(gamma, beta, mean, var):
        s = gamma / jnp.sqrt(var + eps)
        return s, beta - mean * s

    cpad = _round_up(out_c, 128)   # lane-dense (multiple-of-128) output columns

    def pack(w_mat, bnp):
        # Fold BN scale into weight columns, zero-pad to cpad, cast to bf16.
        s, b = fold(*bnp)
        w = jnp.pad(w_mat * s[None, :], ((0, 0), (0, cpad - out_c)))
        return (w.astype(jnp.bfloat16),
                jnp.pad(b, (0, cpad - out_c)).astype(jnp.float32))

    p = {'cpad': cpad}
    p['w1_oihw'] = 0.2 * jax.random.normal(ks[0], (out_c, in_c, 3, 3), jnp.float32)
    p['w2_oihw'] = 0.2 * jax.random.normal(ks[1], (out_c, out_c, 3, 3), jnp.float32)
    p['bn1'] = bn_init(ks[2], out_c)
    p['bn2'] = bn_init(ks[3], out_c)
    # GEMM-layout weights: (kh, kw, cin, cout) -> (9*cin, cout); row order
    # matches the im2col patch order [(dy, dx) major, cin minor].
    w1_mat = p['w1_oihw'].transpose(2, 3, 1, 0).reshape(9 * in_c, out_c)
    w2_mat = p['w2_oihw'].transpose(2, 3, 1, 0).reshape(9 * out_c, out_c)
    p['w1_mat'], p['b1'] = pack(w1_mat, p['bn1'])
    p['w2_mat'], p['b2'] = pack(w2_mat, p['bn2'])
    if stride != 1 or in_c != out_c:
        p['wsc_oihw'] = 0.2 * jax.random.normal(ks[4], (out_c, in_c, 1, 1), jnp.float32)
        p['bnsc'] = bn_init(ks[5], out_c)
        wsc_mat = p['wsc_oihw'].transpose(2, 3, 1, 0).reshape(in_c, out_c)
        p['wsc_mat'], p['bsc'] = pack(wsc_mat, p['bnsc'])
    return p


def basic_block_pallas(x_nchw, p, *, stride, in_c, out_c):
    # Layout: NCHW (PyTorch) in/out; compute on NHWC flattened to (M, C),
    # bf16 activations on the MXU path, f32 accumulation inside the kernel.
    x = jnp.transpose(x_nchw, (0, 2, 3, 1)).astype(jnp.bfloat16)  # NHWC bf16
    n, h, w, _ = x.shape
    ho = (h - 1) // stride + 1
    wo = (w - 1) // stride + 1
    cpad = p['cpad']

    # conv1 (3x3, stride) + bn1 + relu; intermediate kept in bf16
    p1 = _im2col3x3(x, stride)
    h1 = fused_conv_gemm(p1, p['w1_mat'], p['b1'], relu=True,
                         out_dtype=jnp.bfloat16)
    h1 = h1[:, :out_c].reshape(n, ho, wo, out_c)

    # conv2 (3x3, stride 1) + bn2 + shortcut + relu, fully fused in one kernel
    p2 = _im2col3x3(h1, 1)
    if stride != 1 or in_c != out_c:
        # projection shortcut (1x1 conv + BN) fused as a second dot in-kernel
        xs = x[:, ::stride, ::stride, :].reshape(n * ho * wo, in_c)
        out = fused_conv_gemm(p2, p['w2_mat'], p['b2'], relu=True,
                              shortcut=(xs, p['wsc_mat'], p['bsc']))
    else:
        res = x.reshape(n * h * w, in_c)
        if cpad != out_c:  # zero-padded residual cols line up with zero weights
            res = jnp.pad(res, ((0, 0), (0, cpad - out_c)))
        out = fused_conv_gemm(p2, p['w2_mat'], p['b2'], relu=True, residual=res)

    out = out[:, :out_c].reshape(n, ho, wo, out_c).astype(jnp.float32)
    return jnp.transpose(out, (0, 3, 1, 2))  # back to NCHW


# ----------------------------------------------------------------------------
# Pure-JAX reference (mirrors the PyTorch module, eval-mode BN, full f32)
# ----------------------------------------------------------------------------
def reference_basic_block(x, p, *, stride, in_c, out_c, eps=1e-5):
    dn = ('NCHW', 'OIHW', 'NCHW')

    def bn(y, bnp):
        g, b, m, v = bnp
        return ((y - m[None, :, None, None]) / jnp.sqrt(v + eps)[None, :, None, None]
                * g[None, :, None, None] + b[None, :, None, None])

    out = jax.lax.conv_general_dilated(x, p['w1_oihw'], (stride, stride),
                                       ((1, 1), (1, 1)), dimension_numbers=dn)
    out = jax.nn.relu(bn(out, p['bn1']))
    out = jax.lax.conv_general_dilated(out, p['w2_oihw'], (1, 1),
                                       ((1, 1), (1, 1)), dimension_numbers=dn)
    out = bn(out, p['bn2'])
    if stride != 1 or in_c != out_c:
        sc = jax.lax.conv_general_dilated(x, p['wsc_oihw'], (stride, stride),
                                          ((0, 0), (0, 0)), dimension_numbers=dn)
        sc = bn(sc, p['bnsc'])
    else:
        sc = x
    return jax.nn.relu(out + sc)


# ----------------------------------------------------------------------------
if __name__ == "__main__":
    key = jax.random.PRNGKey(0)
    kx, kp1, kp2 = jax.random.split(key, 3)

    N, C, H, W = 2, 4, 16, 16
    x = jax.random.normal(kx, (N, C, H, W), jnp.float32)

    # bf16 operands (f32 accumulation) -> tolerance loosened vs the f32 reference.
    RTOL, ATOL = 1e-1, 1.5e-1

    # Case 1: identity shortcut (stride=1, in_c == out_c)
    params1 = init_basic_block_params(kp1, in_c=C, out_c=C, stride=1)
    y1 = jax.block_until_ready(
        basic_block_pallas(x, params1, stride=1, in_c=C, out_c=C))
    y1_ref = reference_basic_block(x, params1, stride=1, in_c=C, out_c=C)
    assert y1.shape == (N, C, H, W)
    assert jnp.allclose(y1, y1_ref, rtol=RTOL, atol=ATOL), \
        float(jnp.max(jnp.abs(y1 - y1_ref)))

    # Case 2: projection shortcut (stride=2, out_c != in_c)
    out_c2 = 8
    params2 = init_basic_block_params(kp2, in_c=C, out_c=out_c2, stride=2)
    y2 = jax.block_until_ready(
        basic_block_pallas(x, params2, stride=2, in_c=C, out_c=out_c2))
    y2_ref = reference_basic_block(x, params2, stride=2, in_c=C, out_c=out_c2)
    assert y2.shape == (N, out_c2, H // 2, W // 2)
    assert jnp.allclose(y2, y2_ref, rtol=RTOL, atol=ATOL), \
        float(jnp.max(jnp.abs(y2 - y2_ref)))

    print("KERNEL_OK")
</pallas_src>

<mosaic_0001>
module attributes {stable_mosaic.version = 11 : i64} {
  func.func @_fused_gemm_kernel(%arg0: i32, %arg1: memref<256x36xbf16, #tpu.memory_space<vmem>>, %arg2: memref<36x128xbf16, #tpu.memory_space<vmem>>, %arg3: memref<1x128xf32, #tpu.memory_space<vmem>>, %arg4: memref<256x128xbf16, #tpu.memory_space<vmem>>) attributes {dimension_semantics = [#tpu.dimension_semantics<parallel>], iteration_bounds = array<i64: 2>, scalar_prefetch = 0 : i64, scratch_operands = 0 : i64, tpu.core_type = #tpu.core_type<tc>, window_params = [{transform_indices = @transform_0, window_bounds = array<i64: 256, 36>}, {pipeline_mode = #tpu.pipeline_mode<synchronous>, transform_indices = @transform_1, window_bounds = array<i64: 36, 128>}, {pipeline_mode = #tpu.pipeline_mode<synchronous>, transform_indices = @transform_2, window_bounds = array<i64: 1, 128>}, {transform_indices = @transform_3, window_bounds = array<i64: 256, 128>}]} {
    %c0 = arith.constant 0 : index
    %c0_0 = arith.constant 0 : index
    %0 = vector.load %arg1[%c0, %c0_0] : memref<256x36xbf16, #tpu.memory_space<vmem>>, vector<256x36xbf16>
    %c0_1 = arith.constant 0 : index
    %c0_2 = arith.constant 0 : index
    %1 = vector.load %arg2[%c0_1, %c0_2] : memref<36x128xbf16, #tpu.memory_space<vmem>>, vector<36x128xbf16>
    %cst = arith.constant dense<0.000000e+00> : vector<256x128xf32>
    %2 = tpu.matmul %0, %1, %cst {dimension_numbers = #tpu.dot_dimension_numbers<[1], [0], [0], [1], [0, 0, 1, 1], [], []>} : vector<256x36xbf16>, vector<36x128xbf16>, vector<256x128xf32> -> vector<256x128xf32>
    %c0_3 = arith.constant 0 : index
    %c0_4 = arith.constant 0 : index
    %3 = vector.load %arg3[%c0_3, %c0_4] : memref<1x128xf32, #tpu.memory_space<vmem>>, vector<1x128xf32>
    %4 = vector.broadcast %3 : vector<1x128xf32> to vector<256x128xf32>
    %5 = arith.addf %2, %4 : vector<256x128xf32>
    %cst_5 = arith.constant 0.000000e+00 : f32
    %6 = vector.broadcast %cst_5 : f32 to vector<256x128xf32>
    %7 = arith.maximumf %5, %6 : vector<256x128xf32>
    %8 = arith.truncf %7 : vector<256x128xf32> to vector<256x128xbf16>
    %c0_6 = arith.constant 0 : index
    %c0_7 = arith.constant 0 : index
    %9 = vector.load %arg4[%c0_6, %c0_7] : memref<256x128xbf16, #tpu.memory_space<vmem>>, vector<256x128xbf16>
    tpu.vector_store %arg4[%c0_6, %c0_7], %8 {strides = array<i32>} : memref<256x128xbf16, #tpu.memory_space<vmem>>, vector<256x128xbf16>,
    return
  }
  func.func @transform_0(%arg0: i32) -> (i32, i32) {
    %c0_i32 = arith.constant 0 : i32
    %c0_i32_0 = arith.constant 0 : i32
    return %arg0, %c0_i32 : i32, i32
  }
  func.func @transform_1(%arg0: i32) -> (i32, i32) {
    %c0_i32 = arith.constant 0 : i32
    %c0_i32_0 = arith.constant 0 : i32
    %c0_i32_1 = arith.constant 0 : i32
    return %c0_i32, %c0_i32_0 : i32, i32
  }
  func.func @transform_2(%arg0: i32) -> (i32, i32) {
    %c0_i32 = arith.constant 0 : i32
    %c0_i32_0 = arith.constant 0 : i32
    %c0_i32_1 = arith.constant 0 : i32
    return %c0_i32, %c0_i32_0 : i32, i32
  }
  func.func @transform_3(%arg0: i32) -> (i32, i32) {
    %c0_i32 = arith.constant 0 : i32
    %c0_i32_0 = arith.constant 0 : i32
    return %arg0, %c0_i32 : i32, i32
  }
}

</mosaic_0001>

<bundles_post_ra>
// kernel: tpu_custom_call.1
= control target key start
LH: loop header
LB: loop body
LE: loop exit
PB: predicated region body
PF: predicated region fallthrough
CT: control target
= control target key end

     0   :  { %8 = vsyncpa [#allocation3], 0  ;;  %s1419_s0 = inlined_call_operand.vmem [shape: bf16[512,36], index: 0, kind: input, shape index: {}]   ;;  %s1420_s1 = inlined_call_operand.vmem [shape: bf16[36,128], index: 1, kind: input, shape index: {}]   ;;  %s1421_s2 = inlined_call_operand.vmem [shape: f32[1,128], index: 2, kind: input, shape index: {}]   ;;  %s1422_s3 = inlined_call_operand.hbm [shape: bf16[512,128], index: 3, kind: output, shape index: {}]  }
   0x1   :  { %10 = vsyncpa [#allocation3 + $0x1], 0  ;;  %s1214_s12 = smov 0   ;;  %s1216_s13 = smov 0  }
   0x2   :  { %s1218_s14 = smov 0   ;;  %s1220_s15 = smov 0  }
   0x3 LB: > { %s1235_s16 = sadd.s32 4294967295, %s1189_s15   ;;  %s794_s17 = sadd.s32 4294967294, %s1189_s15   ;;  %s1189_s15 = sphi %s1220_s15, %s1428_s15   ;;  %s1185_s14 = sphi %s1218_s14, %s1427_s14   ;;  %s1181_s13 = sphi %s1216_s13, %s1426_s13   ;;  %s1177_s12 = sphi %s1214_s12, %s1425_s12  }
   0x4   : > { %s1239_s18 = sadd.s32 1, %s1189_s15   ;;  %s91_s19 = sadd.s32 1, %s1185_s14 }
   0x5   : > { %s88_s20 = ssub.s32 %s1189_s15, %s1239_s18  ;;  %p101_p0 = scmp.ne.s32.totalorder %s1185_s14, %s1181_s13 }
   0x6   : > { %p89_p1 = scmp.eq.s32.totalorder %s88_s20, 0  ;;  %p102_p2 = scmp.eq.s32.totalorder %s1235_s16, 1 }
   0x7   : > { %p107_p3 = scmp.ne.s32.totalorder %s1181_s13, %s1177_s12  ;;  %p108_p4 = scmp.eq.s32.totalorder %s794_s17, 1 }
   0x8   : > { %s1250_s21 = scalar_select %p89_p1, %s1185_s14, %s91_s19  }
   0x9   : > { %p1252_p5 = por %p102_p2, %p101_p0  ;;  %p1256_p6 = por %p108_p4, %p107_p3 }
   0xa   : > { %p797_p7 = scmp.ge.s32.totalorder %s1189_s15, 1  ;;  %p141_p8 = scmp.lt.s32.totalorder %s1189_s15, 3 }
   0xc   : > { %p142_p9 = pnand %p797_p7, %p141_p8 }
   0xd   : > { %v1108_v0 = vld [vmem:[%s1420_s1] sm:$0xff] (!%p142_p9)   ;;  %v1109_v1 = vld [vmem:[%s1420_s1 + $0x8] sm:$0xff] (!%p142_p9)   ;;  %s799_s28 = sshll.u32 (!%p142_p9), %s1235_s16, 5  ;;  %v1110_v2 = vld [vmem:[%s1420_s1 + $0x10] ss:$0 sps:$4 sm:$0x33] (!%p142_p9)  }
   0xe   : > { %145 = sbr.rel (%p142_p9) target bundleno = 287 (0x11f), region = 32  ;;  %1021 = vmatprep.subr.bf16.mxu0 (!%p142_p9), %v1108_v0  ;;  %1059 = vmatprep.subr.bf16.mxu1 (!%p142_p9), %v1108_v0  ;;  %p166_p10 = scmp.lt.s32.totalorder (!%p142_p9), %s799_s28, 63  ;;  %vm361_vm0 = vcmask (!%p142_p9), 1041408   ;;  %vm312_vm1 = vcmask (!%p142_p9), 293888   ;;  %v1312_v20 = vld [vmem:[%s1421_s2] ss:$0 sm:$0xff] (!%p142_p9) }
   0xf   : > { %1022 = vmatpush3.bf16.msra.mxu0 (!%p142_p9), %v1108_v0  ;;  %1062 = vmatpush3.bf16.msra.mxu1 (!%p142_p9), %v1108_v0  ;;  %v363_v3 = vsel (!%p142_p9), %vm361_vm0, %v1110_v2, 0  ;;  %s162_s10 = sand.u32 (!%p142_p9), 1, %s1181_s13   ;;  %s906_s19 = sshll.u32 (!%p142_p9), %s1235_s16, 11 }
  0x10   : > { %1023 = vmatprep.subr.bf16.mxu0 (!%p142_p9), %v1109_v1  ;;  %1060 = vmatprep.subr.bf16.mxu1 (!%p142_p9), %v1109_v1  ;;  %s798_s11 = sshll.u32 (!%p142_p9), %s162_s10, 7  ;;  %s1368_s16 = scalar_lea.hbm (!%p142_p9), %s1422_s3, %s906_s19 }
  0x11   : > { %s1325_s17 = scalar_lea.vmem (!%p142_p9), [#allocation2], %s798_s11  ;;  %s1378_s26 = scalar_lea.sflag (!%p142_p9), [#allocation3], %s162_s10 }
  0x12   : > { %s732_s20 = sshll.u32 (!%p142_p9), %s1325_s17, 4  ;;  %s1370_s20 = int_to_ptr.vmem [resolvable:$true] %s732_s20 }
  0x13   : > { %1024 = vmatpush3.bf16.msra.mxu0 (!%p142_p9), %v1109_v1  ;;  %1063 = vmatpush3.bf16.msra.mxu1 (!%p142_p9), %v1109_v1  ;;  %s1127_s27 = scalar_lea.vmem (!%p142_p9), %s1370_s20, 2048 }
  0x14   : > { %1065 = vmatprep.subr.msk.bf16.mxu0 (!%p142_p9), %vm361_vm0, %v1110_v2  ;;  %1066 = vmatprep.subr.msk.bf16.mxu1 (!%p142_p9), %vm361_vm0, %v1110_v2  ;;  %p1128_p11 = scmp.ne.s32.totalorder (!%p142_p9), %s1370_s20, %s1127_s27 }
  0x15   : > { %s1430_s28 = smov (!%p166_p10, %s799_s28), 63 }
  0x16   : > { %s800_s4 = sshll.u32 %s1430_s28, 2  ;;  %p1129_p12 = pnand %p1128_p11, %p1252_p5 }
  0x17   : > { %s1275_s7 = scalar_lea.vmem %s1419_s0, %s800_s4  ;;  %1026 = vmatpush3.bf16.msra.mxu0 %v363_v3  ;;  %1064 = vmatpush3.bf16.msra.mxu1 %v363_v3  ;;  %s1191_s28 = smov [#allocation2]  }
  0x18   : > { %v1111_v4 = vld [vmem:[%s1275_s7] sm:$0xff]   ;;  %v1113_v6 = vld [vmem:[%s1275_s7 + $0x8] sm:$0xff]   ;;  %v1115_v8 = vld [vmem:[%s1275_s7 + $0x10] sm:$0xff]   ;;  %p1130_p13 = pneg %p1129_p12  ;;  %s1131_s29 = sshll.u32 %s1191_s28, 4  ;;  %s1132_s29 = int_to_ptr.vmem [resolvable:$false] %s1131_s29 }
  0x19   : > { %v1112_v5 = vld [vmem:[%s1275_s7 + $0x40] sm:$0xff]   ;;  %1027 = vmatprep.mubr.msk.bf16.mxu0 %vm312_vm1, %v1111_v4  ;;  %v1114_v7 = vld [vmem:[%s1275_s7 + $0x48] sm:$0xff]   ;;  %v1116_v9 = vld [vmem:[%s1275_s7 + $0x50] sm:$0xff]   ;;  %s1133_s30 = scalar_lea.vmem %s1132_s29, 4096  ;;  %p1134_p0 = scmp.lt.s32.totalorder %s1370_s20, %s1132_s29 }
  0x1a   : > { %1043 = vmatprep.mubr.msk.bf16.mxu1 %vm312_vm1, %v1112_v5  ;;  %1028 = vmatmul.mubr.msk.bf16.vlgmr.msra.gmra.mrb[0].mxu0 %vm312_vm1, %v1113_v6  ;;  %v1117_v10 = vld [vmem:[%s1275_s7 + $0x18] sm:$0xff]   ;;  %v1119_v12 = vld [vmem:[%s1275_s7 + $0x20] sm:$0xff]   ;;  %v1121_v14 = vld [vmem:[%s1275_s7 + $0x28] sm:$0xff]   ;;  %p1135_p1 = scmp.lt.s32.totalorder %s1133_s30, %s1127_s27 }
  0x1b   : > { %1044 = vmatmul.mubr.msk.bf16.vlgmr.msra.gmra.mrb[0].mxu1 %vm312_vm1, %v1114_v7  ;;  %1031 = vmatprep.mubr.msk.bf16.mxu0 %vm312_vm1, %v1115_v8  ;;  %v1118_v11 = vld [vmem:[%s1275_s7 + $0x58] sm:$0xff]   ;;  %v1120_v13 = vld [vmem:[%s1275_s7 + $0x60] sm:$0xff]   ;;  %v1122_v15 = vld [vmem:[%s1275_s7 + $0x68] sm:$0xff]  }
  0x1c   : > { %1047 = vmatprep.mubr.msk.bf16.mxu1 %vm312_vm1, %v1116_v9  ;;  %v1123_v16 = vld [vmem:[%s1275_s7 + $0x30] sm:$0xff]   ;;  %v1125_v18 = vld [vmem:[%s1275_s7 + $0x38] sm:$0xff]   ;;  %p1136_p2 = por %p1135_p1, %p1134_p0 }
  0x1d   : > { %v1124_v17 = vld [vmem:[%s1275_s7 + $0x70] sm:$0xff]   ;;  %v1126_v19 = vld [vmem:[%s1275_s7 + $0x78] sm:$0xff]  }
  0x1e   : > { %p1137_p3 = pnand %p1136_p2, %p1130_p13 }
  0x22   : > { %1032 = vmatmul.mubr.msk.bf16.gmra.mrb[4].mxu0 %vm312_vm1, %v1117_v10 }
  0x23   : > { %1048 = vmatmul.mubr.msk.bf16.gmra.mrb[4].mxu1 %vm312_vm1, %v1118_v11  ;;  %1035 = vmatprep.mubr.msk.bf16.mxu0 %vm312_vm1, %v1119_v12 }
  0x24   : > { %1051 = vmatprep.mubr.msk.bf16.mxu1 %vm312_vm1, %v1120_v13 }
  0x2a   : > { %1036 = vmatmul.mubr.msk.bf16.gmra.mrb[8].mxu0 %vm312_vm1, %v1121_v14 }
  0x2b   : > { %1052 = vmatmul.mubr.msk.bf16.gmra.mrb[8].mxu1 %vm312_vm1, %v1122_v15  ;;  %1039 = vmatprep.mubr.msk.bf16.mxu0 %vm312_vm1, %v1123_v16 }
  0x2c   : > { %1055 = vmatprep.mubr.msk.bf16.mxu1 %vm312_vm1, %v1124_v17 }
  0x32   : > { %1040 = vmatmul.mubr.msk.bf16.gmra.mrb[12].mxu0 %vm312_vm1, %v1125_v18 }
  0x33   : > { %1056 = vmatmul.mubr.msk.bf16.gmra.mrb[12].mxu1 %vm312_vm1, %v1126_v19 }
  0xed   : > { %v1029_v21 = vpop.f32.mrb[0].mxu0 }
  0xee   : > { %v1045_v22 = vpop.f32.mrb[0].mxu1  ;;  %v408_v23 = vadd.f32 %v1029_v21, %v1312_v20  ;;  %v399_v25 = vpop.f32.mrb[1].mxu0 }
  0xef   : > { %v472_v24 = vadd.f32 %v1045_v22, %v1312_v20  ;;  %v463_v26 = vpop.f32.mrb[1].mxu1  ;;  %v400_v27 = vadd.f32 %v1312_v20, %v399_v25  ;;  %v1030_v29 = vpop.f32.mrb[2].mxu0 }
  0xf0   : > { %v464_v28 = vadd.f32 %v1312_v20, %v463_v26  ;;  %v1046_v30 = vpop.f32.mrb[2].mxu1  ;;  %v411_v31 = vadd.f32 %v1030_v29, %v1312_v20  ;;  %v402_v33 = vpop.f32.mrb[3].mxu0  ;;  %v528_v37 = vmax.f32 %v408_v23, 0.0 }
  0xf1   : > { %v475_v32 = vadd.f32 %v1046_v30, %v1312_v20  ;;  %v466_v34 = vpop.f32.mrb[3].mxu1  ;;  %v403_v35 = vadd.f32 %v1312_v20, %v402_v33  ;;  %v544_v38 = vmax.f32 %v472_v24, 0.0  ;;  %v526_v41 = vmax.f32 %v400_v27, 0.0 }
  0xf2   : > { %v467_v36 = vadd.f32 %v1312_v20, %v466_v34  ;;  %v529_v39 = vmax.f32 %v411_v31, 0.0  ;;  %v542_v42 = vmax.f32 %v464_v28, 0.0 }
  0xf3   : > { %v545_v40 = vmax.f32 %v475_v32, 0.0  ;;  %v527_v43 = vmax.f32 %v403_v35, 0.0 }
  0xf4   : > { %v543_v44 = vmax.f32 %v467_v36, 0.0  ;;  %v915_v45 = vpack.c.bf16 %v529_v39, %v528_v37 }
  0xf5   : > { %v955_v46 = vpack.c.bf16 %v545_v40, %v544_v38  ;;  %v910_v47 = vpack.c.bf16 %v527_v43, %v526_v41  ;;  %v1033_v49 = vpop.f32.mrb[4].mxu0 }
  0xf6   : > { %v950_v48 = vpack.c.bf16 %v543_v44, %v542_v42  ;;  %v1049_v50 = vpop.f32.mrb[4].mxu1  ;;  %987 = vst [vmem:[%s1325_s17 + $0x8] sm:$0xff] %v915_v45   ;;  %v424_v51 = vadd.f32 %v1033_v49, %v1312_v20  ;;  %v415_v53 = vpop.f32.mrb[5].mxu0 }
  0xf7   : > { %995 = vst [vmem:[%s1325_s17 + $0x48] sm:$0xff] %v955_v46   ;;  %v488_v52 = vadd.f32 %v1049_v50, %v1312_v20  ;;  %v479_v54 = vpop.f32.mrb[5].mxu1  ;;  %911 = vst [vmem:[%s1325_s17] sm:$0xff] %v910_v47   ;;  %v416_v55 = vadd.f32 %v1312_v20, %v415_v53  ;;  %v1034_v57 = vpop.f32.mrb[6].mxu0 }
  0xf8   : > { %994 = vst [vmem:[%s1325_s17 + $0x40] sm:$0xff] %v950_v48   ;;  %v480_v56 = vadd.f32 %v1312_v20, %v479_v54  ;;  %v1050_v58 = vpop.f32.mrb[6].mxu1  ;;  %v427_v59 = vadd.f32 %v1034_v57, %v1312_v20  ;;  %v418_v61 = vpop.f32.mrb[7].mxu0  ;;  %v532_v1 = vmax.f32 %v424_v51, 0.0 }
  0xf9   : > { %v491_v60 = vadd.f32 %v1050_v58, %v1312_v20  ;;  %v482_v62 = vpop.f32.mrb[7].mxu1  ;;  %v419_v63 = vadd.f32 %v1312_v20, %v418_v61  ;;  %v548_v2 = vmax.f32 %v488_v52, 0.0  ;;  %v530_v5 = vmax.f32 %v416_v55, 0.0 }
  0xfa   : > { %v483_v0 = vadd.f32 %v1312_v20, %v482_v62  ;;  %v533_v3 = vmax.f32 %v427_v59, 0.0  ;;  %v546_v6 = vmax.f32 %v480_v56, 0.0 }
  0xfb   : > { %v549_v4 = vmax.f32 %v491_v60, 0.0  ;;  %v531_v7 = vmax.f32 %v419_v63, 0.0 }
  0xfc   : > { %v547_v8 = vmax.f32 %v483_v0, 0.0  ;;  %v925_v9 = vpack.c.bf16 %v533_v3, %v532_v1 }
  0xfd   : > { %v965_v10 = vpack.c.bf16 %v549_v4, %v548_v2  ;;  %v920_v11 = vpack.c.bf16 %v531_v7, %v530_v5  ;;  %v1037_v13 = vpop.f32.mrb[8].mxu0 }
  0xfe   : > { %v960_v12 = vpack.c.bf16 %v547_v8, %v546_v6  ;;  %v1053_v14 = vpop.f32.mrb[8].mxu1  ;;  %989 = vst [vmem:[%s1325_s17 + $0x18] sm:$0xff] %v925_v9   ;;  %v440_v15 = vadd.f32 %v1037_v13, %v1312_v20  ;;  %v431_v17 = vpop.f32.mrb[9].mxu0 }
  0xff   : > { %997 = vst [vmem:[%s1325_s17 + $0x58] sm:$0xff] %v965_v10   ;;  %v504_v16 = vadd.f32 %v1053_v14, %v1312_v20  ;;  %v495_v18 = vpop.f32.mrb[9].mxu1  ;;  %988 = vst [vmem:[%s1325_s17 + $0x10] sm:$0xff] %v920_v11   ;;  %v432_v19 = vadd.f32 %v1312_v20, %v431_v17  ;;  %v1038_v22 = vpop.f32.mrb[10].mxu0 }
 0x100   : > { %996 = vst [vmem:[%s1325_s17 + $0x50] sm:$0xff] %v960_v12   ;;  %v496_v21 = vadd.f32 %v1312_v20, %v495_v18  ;;  %v1054_v23 = vpop.f32.mrb[10].mxu1  ;;  %v443_v24 = vadd.f32 %v1038_v22, %v1312_v20  ;;  %v434_v26 = vpop.f32.mrb[11].mxu0  ;;  %v536_v30 = vmax.f32 %v440_v15, 0.0 }
 0x101   : > { %v507_v25 = vadd.f32 %v1054_v23, %v1312_v20  ;;  %v498_v27 = vpop.f32.mrb[11].mxu1  ;;  %v435_v28 = vadd.f32 %v1312_v20, %v434_v26  ;;  %v552_v31 = vmax.f32 %v504_v16, 0.0  ;;  %v534_v34 = vmax.f32 %v432_v19, 0.0 }
 0x102   : > { %v499_v29 = vadd.f32 %v1312_v20, %v498_v27  ;;  %v537_v32 = vmax.f32 %v443_v24, 0.0  ;;  %v550_v35 = vmax.f32 %v496_v21, 0.0 }
 0x103   : > { %v553_v33 = vmax.f32 %v507_v25, 0.0  ;;  %v535_v36 = vmax.f32 %v435_v28, 0.0 }
 0x104   : > { %v551_v37 = vmax.f32 %v499_v29, 0.0  ;;  %v935_v38 = vpack.c.bf16 %v537_v32, %v536_v30 }
 0x105   : > { %v975_v39 = vpack.c.bf16 %v553_v33, %v552_v31  ;;  %v930_v40 = vpack.c.bf16 %v535_v36, %v534_v34  ;;  %v1041_v42 = vpop.f32.mrb[12].mxu0 }
 0x106   : > { %v970_v41 = vpack.c.bf16 %v551_v37, %v550_v35  ;;  %v1057_v43 = vpop.f32.mrb[12].mxu1  ;;  %991 = vst [vmem:[%s1325_s17 + $0x28] sm:$0xff] %v935_v38   ;;  %v456_v44 = vadd.f32 %v1041_v42, %v1312_v20  ;;  %v447_v46 = vpop.f32.mrb[13].mxu0 }
 0x107   : > { %999 = vst [vmem:[%s1325_s17 + $0x68] sm:$0xff] %v975_v39   ;;  %v520_v45 = vadd.f32 %v1057_v43, %v1312_v20  ;;  %v511_v47 = vpop.f32.mrb[13].mxu1  ;;  %990 = vst [vmem:[%s1325_s17 + $0x20] sm:$0xff] %v930_v40   ;;  %v448_v48 = vadd.f32 %v1312_v20, %v447_v46  ;;  %v1042_v50 = vpop.f32.mrb[14].mxu0 }
 0x108   : > { %998 = vst [vmem:[%s1325_s17 + $0x60] sm:$0xff] %v970_v41   ;;  %v512_v49 = vadd.f32 %v1312_v20, %v511_v47  ;;  %v1058_v51 = vpop.f32.mrb[14].mxu1  ;;  %v459_v52 = vadd.f32 %v1042_v50, %v1312_v20  ;;  %v450_v54 = vpop.f32.mrb[15].mxu0  ;;  %v540_v58 = vmax.f32 %v456_v44, 0.0 }
 0x109   : > { %v523_v53 = vadd.f32 %v1058_v51, %v1312_v20  ;;  %v514_v55 = vpop.f32.mrb[15].mxu1  ;;  %v451_v56 = vadd.f32 %v1312_v20, %v450_v54  ;;  %v556_v59 = vmax.f32 %v520_v45, 0.0  ;;  %v538_v62 = vmax.f32 %v448_v48, 0.0 }
 0x10a   : > { %v515_v57 = vadd.f32 %v1312_v20, %v514_v55  ;;  %v541_v60 = vmax.f32 %v459_v52, 0.0  ;;  %v554_v63 = vmax.f32 %v512_v49, 0.0 }
 0x10b   : > { %v557_v61 = vmax.f32 %v523_v53, 0.0  ;;  %v539_v0 = vmax.f32 %v451_v56, 0.0 }
 0x10c   : > { %v555_v1 = vmax.f32 %v515_v57, 0.0  ;;  %v945_v2 = vpack.c.bf16 %v541_v60, %v540_v58 }
 0x10d   : > { %v985_v3 = vpack.c.bf16 %v557_v61, %v556_v59  ;;  %v940_v20 = vpack.c.bf16 %v539_v0, %v538_v62 }
 0x10e   : > { %v980_v4 = vpack.c.bf16 %v555_v1, %v554_v63  ;;  %993 = vst [vmem:[%s1325_s17 + $0x38] sm:$0xff] %v945_v2  }
 0x10f   : > { %1001 = vst [vmem:[%s1325_s17 + $0x78] sm:$0xff] %v985_v3   ;;  %992 = vst [vmem:[%s1325_s17 + $0x30] sm:$0xff] %v940_v20  }
 0x110   : > { %1000 = vst [vmem:[%s1325_s17 + $0x70] sm:$0xff] %v980_v4  }
 0x111   : > { %1140 = shalt.err (!%p1137_p3)
}
 0x112   : > { %s1141_s4 = scalar_lea.hbm %s1368_s16, 2048  ;;  %s1145_s7 = scalar_lea.hbm %s1422_s3, 4096 }
 0x113   : > { %p1142_p4 = scmp.ne.s32.totalorder %s1368_s16, %s1141_s4  ;;  %p1146_p9 = scmp.lt.u32.totalorder %s1368_s16, %s1422_s3 }
 0x114   : > { %p1147_p10 = scmp.lt.u32.totalorder %s1145_s7, %s1141_s4  ;;  %p1149_p12 = scmp.lt.u32.totalorder %s1141_s4, %s1368_s16 }
 0x115   : > { %p1143_p7 = pnand %p1142_p4, %p1252_p5 }
 0x116   : > { %p1148_p11 = por %p1147_p10, %p1146_p9 }
 0x117   : > { %p1144_p8 = pneg %p1143_p7 }
 0x118   : > { %p1150_p13 = por %p1149_p12, %p1148_p11 }
 0x11a   : > { %p1151_p0 = pnand %p1150_p13, %p1144_p8 }
 0x11c   : > { %1154 = shalt.err (!%p1151_p0)
}
 0x11d   : > { %s1192_s10 = smov 64   ;;  %s1193_s11 = smov 4  }
 0x11e   : > { %1067 = dma.vmem_to_hbm [thread:$0]  (%p1252_p5), %s1370_s20, 2048, %s1368_s16, %s1378_s26, %s1192_s10, %s1192_s10, %s1193_s11  }
 0x11f PF: > { %p1073_p1 = scmp.ge.s32.totalorder %s1189_s15, 2  ;;  %s747_s17 = sand.u32 1, %s1177_s12  }
 0x120   : > { %s748_s19 = scalar_lea.sflag [#allocation3], %s747_s17 }
 0x121   : > { %p1070_p2 = pnand %p1073_p1, %p1256_p6 }
 0x123   : > { %1172 = dma.done.wait (!%p1070_p2), %s748_s19, 2048  }
 0x124   : > { %1174 = vsyncadd (!%p1070_p2), %s748_s19, 4294965248  ;;  %p13_p3 = scmp.ge.s32.totalorder %s1239_s18, 4   ;;  %s1425_s12 = smov %s1181_s13 }
 0x125   : > { %s1426_s13 = smov %s1185_s14  ;;  %s1427_s14 = smov %s1250_s21 }
 0x126   : > { %s1428_s15 = smov %s1239_s18  ;;  %15 = sbr.rel (!%p13_p3) target bundleno = 3 (0x3), region = 67 }
 0x12d   :  { %753 = vsyncpa [#allocation3], 1 }
 0x12e   :  { %755 = vsyncpa [#allocation3 + $0x1], 1 }

</bundles_post_ra>
